<compile_context>
chip_gen: v5e
topology: v5e:2x2
jax: 0.10.0
libtpu: 0.0.40
codegen_flags: <defaults>
</compile_context>

<pallas_src>
import jax
import jax.numpy as jnp
from jax.experimental import pallas as pl
from jax.experimental.pallas import tpu as pltpu


def _round_up(v: int, m: int) -> int:
    return (v + m - 1) // m * m


def _pick_tile(dim_p: int, cap: int = 512) -> int:
    """Largest 128-multiple tile <= cap that divides the (128-padded) dim."""
    for t in (512, 384, 256, 128):
        if t <= cap and dim_p % t == 0:
            return t
    return 128


# --------------------- generic tiled  O = A @ B (+ bias) ---------------------
def _mm_kernel(a_ref, b_ref, o_ref, acc_ref):
    k = pl.program_id(1)

    @pl.when(k == 0)
    def _():
        acc_ref[...] = jnp.zeros_like(acc_ref)

    acc_ref[...] += jnp.dot(a_ref[...], b_ref[...], preferred_element_type=jnp.float32)

    @pl.when(k == pl.num_programs(1) - 1)
    def _():
        o_ref[...] = acc_ref[...].astype(o_ref.dtype)


def _mm_bias_kernel(a_ref, b_ref, bias_ref, o_ref, acc_ref):
    k = pl.program_id(1)

    @pl.when(k == 0)
    def _():
        acc_ref[...] = jnp.zeros_like(acc_ref)

    acc_ref[...] += jnp.dot(a_ref[...], b_ref[...], preferred_element_type=jnp.float32)

    @pl.when(k == pl.num_programs(1) - 1)
    def _():
        o_ref[...] = (acc_ref[...] + bias_ref[...]).astype(o_ref.dtype)


def _tiled_matmul(a, b, bias=None, out_dtype=jnp.float32):
    """a: [M, K], b: [K, N] (dims already multiples of 128), bias: [1, N] | None."""
    m, kdim = a.shape
    n = b.shape[1]

    cap = 512 if n <= 512 else 256  # keep VMEM footprint bounded for wide outputs
    tm = _pick_tile(m, cap)
    tk = _pick_tile(kdim, cap)
    grid = (m // tm, kdim // tk)

    cost = pl.CostEstimate(
        flops=2 * m * kdim * n,
        transcendentals=0,
        bytes_accessed=4 * (m * kdim + kdim * n + m * n + (n if bias is not None else 0)),
    )

    in_specs = [
        pl.BlockSpec((tm, tk), lambda i, k: (i, k)),       # A row/reduction tile
        pl.BlockSpec((tk, n), lambda i, k: (k, 0)),        # B reduction tile (all cols)
    ]
    args = (a, b)
    kernel = _mm_kernel
    if bias is not None:
        in_specs.append(pl.BlockSpec((1, n), lambda i, k: (0, 0)))  # resident bias row
        args = (a, b, bias)
        kernel = _mm_bias_kernel

    return pl.pallas_call(
        kernel,
        out_shape=jax.ShapeDtypeStruct((m, n), out_dtype),
        grid_spec=pltpu.PrefetchScalarGridSpec(
            num_scalar_prefetch=0,
            grid=grid,
            in_specs=in_specs,
            out_specs=pl.BlockSpec((tm, n), lambda i, k: (i, 0)),
            scratch_shapes=[pltpu.VMEM((tm, n), jnp.float32)],
        ),
        compiler_params=pltpu.CompilerParams(
            dimension_semantics=("parallel", "arbitrary"),
        ),
        cost_estimate=cost,
    )(*args)


# ------------- fused kernel (used when out_features > in_features) -----------
def _fused_gcn_kernel(adj_ref, x_ref, wt_ref, b_ref, o_ref, acc_ref):
    """acc accumulates (A @ X) rows; epilogue applies W.T + b. Grid = (i, k)."""
    k = pl.program_id(1)

    @pl.when(k == 0)
    def _():
        acc_ref[...] = jnp.zeros_like(acc_ref)

    acc_ref[...] += jnp.dot(
        adj_ref[...], x_ref[...], preferred_element_type=jnp.float32
    )

    @pl.when(k == pl.num_programs(1) - 1)
    def _():
        o_ref[...] = (
            jnp.dot(acc_ref[...], wt_ref[...], preferred_element_type=jnp.float32)
            + b_ref[...]
        ).astype(o_ref.dtype)


@jax.jit
def gcn_layer(adj, x, weight, bias):
    """out = (adj @ x) @ weight.T + bias  (dense GCN_Layer forward)."""
    n, in_f = x.shape
    out_f = weight.shape[0]

    n_p = _round_up(n, 128)
    in_f_p = _round_up(in_f, 128)
    out_f_p = _round_up(out_f, 128)

    f32 = jnp.float32
    adj_p = jnp.pad(adj.astype(f32), ((0, n_p - n), (0, n_p - n)))
    x_p = jnp.pad(x.astype(f32), ((0, n_p - n), (0, in_f_p - in_f)))
    # Pre-transpose the Linear weight: [out_f, in_f] -> [in_f_p, out_f_p].
    wt_p = jnp.pad(weight.astype(f32).T, ((0, in_f_p - in_f), (0, out_f_p - out_f)))
    b_p = jnp.pad(bias.astype(f32), (0, out_f_p - out_f)).reshape(1, out_f_p)

    if out_f_p <= in_f_p:
        # Reassociated order: project first, then aggregate (fewer MXU flops,
        # narrower streamed reduction operand).
        h = _tiled_matmul(x_p, wt_p, out_dtype=f32)            # [n_p, out_f_p]
        out_p = _tiled_matmul(adj_p, h, bias=b_p, out_dtype=x.dtype)
    else:
        # Aggregate first, keep A@X in VMEM, project + bias in the epilogue.
        tm = _pick_tile(n_p)
        tk = _pick_tile(n_p)
        grid = (n_p // tm, n_p // tk)
        cost = pl.CostEstimate(
            flops=2 * n_p * n_p * in_f_p + 2 * n_p * in_f_p * out_f_p,
            transcendentals=0,
            bytes_accessed=4
            * (n_p * n_p + n_p * in_f_p + in_f_p * out_f_p + out_f_p + n_p * out_f_p),
        )
        out_p = pl.pallas_call(
            _fused_gcn_kernel,
            out_shape=jax.ShapeDtypeStruct((n_p, out_f_p), x.dtype),
            grid_spec=pltpu.PrefetchScalarGridSpec(
                num_scalar_prefetch=0,
                grid=grid,
                in_specs=[
                    pl.BlockSpec((tm, tk), lambda i, k: (i, k)),        # A tile
                    pl.BlockSpec((tk, in_f_p), lambda i, k: (k, 0)),    # X tile
                    pl.BlockSpec((in_f_p, out_f_p), lambda i, k: (0, 0)),  # W.T resident
                    pl.BlockSpec((1, out_f_p), lambda i, k: (0, 0)),    # bias resident
                ],
                out_specs=pl.BlockSpec((tm, out_f_p), lambda i, k: (i, 0)),
                scratch_shapes=[pltpu.VMEM((tm, in_f_p), jnp.float32)],
            ),
            compiler_params=pltpu.CompilerParams(
                dimension_semantics=("parallel", "arbitrary"),
            ),
            cost_estimate=cost,
        )(adj_p, x_p, wt_p, b_p)

    return out_p[:n, :out_f]


if __name__ == "__main__":
    # Small shapes consistent with the module: N nodes, in_features -> out_features.
    N, IN_F, OUT_F = 64, 32, 16

    key = jax.random.PRNGKey(0)
    k_adj, k_x, k_w, k_b = jax.random.split(key, 4)

    # Deterministic synthetic adjacency (dense stand-in for the sparse adj_matrix):
    # sparse-ish 0/1 matrix with self loops, row-normalized.
    # TODO(synk): torch.spmm's sparse storage has no Pallas equivalent; adjacency
    # is materialized dense and aggregated on the MXU.
    raw = (jax.random.uniform(k_adj, (N, N)) < 0.1).astype(jnp.float32)
    adj = raw + jnp.eye(N, dtype=jnp.float32)
    adj = adj / jnp.sum(adj, axis=1, keepdims=True)

    x = jax.random.normal(k_x, (N, IN_F), dtype=jnp.float32)

    # nn.Linear(in_features, out_features)-style deterministic init.
    bound = 1.0 / jnp.sqrt(IN_F)
    weight = jax.random.uniform(k_w, (OUT_F, IN_F), minval=-bound, maxval=bound)
    bias = jax.random.uniform(k_b, (OUT_F,), minval=-bound, maxval=bound)

    out = gcn_layer(adj, x, weight, bias)
    out = jax.block_until_ready(out)

    # Reference check (plain JAX) to make sure semantics match the PyTorch forward.
    ref = (adj @ x) @ weight.T + bias
    assert out.shape == (N, OUT_F)
    assert jnp.allclose(out, ref, atol=1e-4, rtol=1e-4)

    print("KERNEL_OK")
</pallas_src>

<mosaic_0001>
module attributes {stable_mosaic.version = 11 : i64} {
  func.func @_mm_bias_kernel(%arg0: i32, %arg1: i32, %arg2: memref<128x128xf32, #tpu.memory_space<vmem>>, %arg3: memref<128x128xf32, #tpu.memory_space<vmem>>, %arg4: memref<1x128xf32, #tpu.memory_space<vmem>>, %arg5: memref<128x128xf32, #tpu.memory_space<vmem>>, %arg6: memref<128x128xf32, #tpu.memory_space<vmem>>) attributes {dimension_semantics = [#tpu.dimension_semantics<parallel>, #tpu.dimension_semantics<arbitrary>], iteration_bounds = array<i64: 1, 1>, scalar_prefetch = 0 : i64, scratch_operands = 1 : i64, tpu.core_type = #tpu.core_type<tc>, window_params = [{transform_indices = @transform_0, window_bounds = array<i64: 128, 128>}, {transform_indices = @transform_1, window_bounds = array<i64: 128, 128>}, {pipeline_mode = #tpu.pipeline_mode<synchronous>, transform_indices = @transform_2, window_bounds = array<i64: 1, 128>}, {transform_indices = @transform_3, window_bounds = array<i64: 128, 128>}]} {
    %c0_i32 = arith.constant 0 : i32
    %0 = arith.cmpi eq, %arg1, %c0_i32 : i32
    %1 = arith.extui %0 : i1 to i32
    %c0_i32_0 = arith.constant 0 : i32
    %2 = arith.cmpi ne, %1, %c0_i32_0 : i32
    scf.if %2 {
      %cst_10 = arith.constant 0.000000e+00 : f32
      %12 = vector.broadcast %cst_10 : f32 to vector<128x128xf32>
      %c0_11 = arith.constant 0 : index
      %c0_12 = arith.constant 0 : index
      %13 = vector.load %arg6[%c0_11, %c0_12] : memref<128x128xf32, #tpu.memory_space<vmem>>, vector<128x128xf32>
      tpu.vector_store %arg6[%c0_11, %c0_12], %12 {strides = array<i32>} : memref<128x128xf32, #tpu.memory_space<vmem>>, vector<128x128xf32>,
    } else {
    }
    %c0 = arith.constant 0 : index
    %c0_1 = arith.constant 0 : index
    %3 = vector.load %arg6[%c0, %c0_1] : memref<128x128xf32, #tpu.memory_space<vmem>>, vector<128x128xf32>
    %c0_2 = arith.constant 0 : index
    %c0_3 = arith.constant 0 : index
    %4 = vector.load %arg2[%c0_2, %c0_3] : memref<128x128xf32, #tpu.memory_space<vmem>>, vector<128x128xf32>
    %c0_4 = arith.constant 0 : index
    %c0_5 = arith.constant 0 : index
    %5 = vector.load %arg3[%c0_4, %c0_5] : memref<128x128xf32, #tpu.memory_space<vmem>>, vector<128x128xf32>
    %cst = arith.constant dense<0.000000e+00> : vector<128x128xf32>
    %6 = tpu.matmul %4, %5, %cst {dimension_numbers = #tpu.dot_dimension_numbers<[1], [0], [0], [1], [0, 0, 1, 1], [], []>} : vector<128x128xf32>, vector<128x128xf32>, vector<128x128xf32> -> vector<128x128xf32>
    %7 = arith.addf %3, %6 : vector<128x128xf32>
    %c0_6 = arith.constant 0 : index
    %c0_7 = arith.constant 0 : index
    %8 = vector.load %arg6[%c0_6, %c0_7] : memref<128x128xf32, #tpu.memory_space<vmem>>, vector<128x128xf32>
    tpu.vector_store %arg6[%c0_6, %c0_7], %7 {strides = array<i32>} : memref<128x128xf32, #tpu.memory_space<vmem>>, vector<128x128xf32>,
    %c0_i32_8 = arith.constant 0 : i32
    %9 = arith.cmpi eq, %arg1, %c0_i32_8 : i32
    %10 = arith.extui %9 : i1 to i32
    %c0_i32_9 = arith.constant 0 : i32
    %11 = arith.cmpi ne, %10, %c0_i32_9 : i32
    scf.if %11 {
      %c0_10 = arith.constant 0 : index
      %c0_11 = arith.constant 0 : index
      %12 = vector.load %arg6[%c0_10, %c0_11] : memref<128x128xf32, #tpu.memory_space<vmem>>, vector<128x128xf32>
      %c0_12 = arith.constant 0 : index
      %c0_13 = arith.constant 0 : index
      %13 = vector.load %arg4[%c0_12, %c0_13] : memref<1x128xf32, #tpu.memory_space<vmem>>, vector<1x128xf32>
      %14 = vector.broadcast %13 : vector<1x128xf32> to vector<128x128xf32>
      %15 = arith.addf %12, %14 : vector<128x128xf32>
      %c0_14 = arith.constant 0 : index
      %c0_15 = arith.constant 0 : index
      %16 = vector.load %arg5[%c0_14, %c0_15] : memref<128x128xf32, #tpu.memory_space<vmem>>, vector<128x128xf32>
      tpu.vector_store %arg5[%c0_14, %c0_15], %15 {strides = array<i32>} : memref<128x128xf32, #tpu.memory_space<vmem>>, vector<128x128xf32>,
    } else {
    }
    return
  }
  func.func @transform_0(%arg0: i32, %arg1: i32) -> (i32, i32) {
    %c0_i32 = arith.constant 0 : i32
    return %arg0, %arg1 : i32, i32
  }
  func.func @transform_1(%arg0: i32, %arg1: i32) -> (i32, i32) {
    %c0_i32 = arith.constant 0 : i32
    %c0_i32_0 = arith.constant 0 : i32
    return %arg1, %c0_i32 : i32, i32
  }
  func.func @transform_2(%arg0: i32, %arg1: i32) -> (i32, i32) {
    %c0_i32 = arith.constant 0 : i32
    %c0_i32_0 = arith.constant 0 : i32
    %c0_i32_1 = arith.constant 0 : i32
    return %c0_i32, %c0_i32_0 : i32, i32
  }
  func.func @transform_3(%arg0: i32, %arg1: i32) -> (i32, i32) {
    %c0_i32 = arith.constant 0 : i32
    %c0_i32_0 = arith.constant 0 : i32
    return %arg0, %c0_i32 : i32, i32
  }
}

module attributes {stable_mosaic.version = 11 : i64} {
  func.func @_mm_kernel(%arg0: i32, %arg1: i32, %arg2: memref<128x128xf32, #tpu.memory_space<vmem>>, %arg3: memref<128x128xf32, #tpu.memory_space<vmem>>, %arg4: memref<128x128xf32, #tpu.memory_space<vmem>>, %arg5: memref<128x128xf32, #tpu.memory_space<vmem>>) attributes {dimension_semantics = [#tpu.dimension_semantics<parallel>, #tpu.dimension_semantics<arbitrary>], iteration_bounds = array<i64: 1, 1>, scalar_prefetch = 0 : i64, scratch_operands = 1 : i64, tpu.core_type = #tpu.core_type<tc>, window_params = [{transform_indices = @transform_0, window_bounds = array<i64: 128, 128>}, {transform_indices = @transform_1, window_bounds = array<i64: 128, 128>}, {transform_indices = @transform_2, window_bounds = array<i64: 128, 128>}]} {
    %c0_i32 = arith.constant 0 : i32
    %0 = arith.cmpi eq, %arg1, %c0_i32 : i32
    %1 = arith.extui %0 : i1 to i32
    %c0_i32_0 = arith.constant 0 : i32
    %2 = arith.cmpi ne, %1, %c0_i32_0 : i32
    scf.if %2 {
      %cst_10 = arith.constant 0.000000e+00 : f32
      %12 = vector.broadcast %cst_10 : f32 to vector<128x128xf32>
      %c0_11 = arith.constant 0 : index
      %c0_12 = arith.constant 0 : index
      %13 = vector.load %arg5[%c0_11, %c0_12] : memref<128x128xf32, #tpu.memory_space<vmem>>, vector<128x128xf32>
      tpu.vector_store %arg5[%c0_11, %c0_12], %12 {strides = array<i32>} : memref<128x128xf32, #tpu.memory_space<vmem>>, vector<128x128xf32>,
    } else {
    }
    %c0 = arith.constant 0 : index
    %c0_1 = arith.constant 0 : index
    %3 = vector.load %arg5[%c0, %c0_1] : memref<128x128xf32, #tpu.memory_space<vmem>>, vector<128x128xf32>
    %c0_2 = arith.constant 0 : index
    %c0_3 = arith.constant 0 : index
    %4 = vector.load %arg2[%c0_2, %c0_3] : memref<128x128xf32, #tpu.memory_space<vmem>>, vector<128x128xf32>
    %c0_4 = arith.constant 0 : index
    %c0_5 = arith.constant 0 : index
    %5 = vector.load %arg3[%c0_4, %c0_5] : memref<128x128xf32, #tpu.memory_space<vmem>>, vector<128x128xf32>
    %cst = arith.constant dense<0.000000e+00> : vector<128x128xf32>
    %6 = tpu.matmul %4, %5, %cst {dimension_numbers = #tpu.dot_dimension_numbers<[1], [0], [0], [1], [0, 0, 1, 1], [], []>} : vector<128x128xf32>, vector<128x128xf32>, vector<128x128xf32> -> vector<128x128xf32>
    %7 = arith.addf %3, %6 : vector<128x128xf32>
    %c0_6 = arith.constant 0 : index
    %c0_7 = arith.constant 0 : index
    %8 = vector.load %arg5[%c0_6, %c0_7] : memref<128x128xf32, #tpu.memory_space<vmem>>, vector<128x128xf32>
    tpu.vector_store %arg5[%c0_6, %c0_7], %7 {strides = array<i32>} : memref<128x128xf32, #tpu.memory_space<vmem>>, vector<128x128xf32>,
    %c0_i32_8 = arith.constant 0 : i32
    %9 = arith.cmpi eq, %arg1, %c0_i32_8 : i32
    %10 = arith.extui %9 : i1 to i32
    %c0_i32_9 = arith.constant 0 : i32
    %11 = arith.cmpi ne, %10, %c0_i32_9 : i32
    scf.if %11 {
      %c0_10 = arith.constant 0 : index
      %c0_11 = arith.constant 0 : index
      %12 = vector.load %arg5[%c0_10, %c0_11] : memref<128x128xf32, #tpu.memory_space<vmem>>, vector<128x128xf32>
      %c0_12 = arith.constant 0 : index
      %c0_13 = arith.constant 0 : index
      %13 = vector.load %arg4[%c0_12, %c0_13] : memref<128x128xf32, #tpu.memory_space<vmem>>, vector<128x128xf32>
      tpu.vector_store %arg4[%c0_12, %c0_13], %12 {strides = array<i32>} : memref<128x128xf32, #tpu.memory_space<vmem>>, vector<128x128xf32>,
    } else {
    }
    return
  }
  func.func @transform_0(%arg0: i32, %arg1: i32) -> (i32, i32) {
    %c0_i32 = arith.constant 0 : i32
    return %arg0, %arg1 : i32, i32
  }
  func.func @transform_1(%arg0: i32, %arg1: i32) -> (i32, i32) {
    %c0_i32 = arith.constant 0 : i32
    %c0_i32_0 = arith.constant 0 : i32
    return %arg1, %c0_i32 : i32, i32
  }
  func.func @transform_2(%arg0: i32, %arg1: i32) -> (i32, i32) {
    %c0_i32 = arith.constant 0 : i32
    %c0_i32_0 = arith.constant 0 : i32
    return %arg0, %c0_i32 : i32, i32
  }
}

</mosaic_0001>

<bundles_post_ra>
// kernel: gcn_layer.2
= control target key start
LH: loop header
LB: loop body
LE: loop exit
PB: predicated region body
PF: predicated region fallthrough
CT: control target
= control target key end

     0   :  { %s422_s1 = inlined_call_operand.vmem [shape: f32[128,128], index: 1, kind: input, shape index: {}]   ;;  %s423_s0 = inlined_call_operand.vmem [shape: f32[128,128], index: 0, kind: input, shape index: {}]   ;;  %s424_s2 = inlined_call_operand.vmem [shape: f32[128,128], index: 2, kind: output, shape index: {}]  }
   0x1   :  { %v78_v0 = vld [vmem:[%s422_s1 + $0x78] sm:$0xff]  ;;  %v77_v1 = vld [vmem:[%s422_s1 + $0x70] sm:$0xff]  ;;  %v76_v2 = vld [vmem:[%s422_s1 + $0x68] sm:$0xff] }
   0x2   :  { %216 = vmatpush.msra.mxu2 %v78_v0  ;;  %217 = vmatpush.msra.mxu3 %v78_v0  ;;  %v75_v3 = vld [vmem:[%s422_s1 + $0x60] sm:$0xff]  ;;  %v74_v4 = vld [vmem:[%s422_s1 + $0x58] sm:$0xff]  ;;  %v73_v5 = vld [vmem:[%s422_s1 + $0x50] sm:$0xff] }
   0x3   :  { %79 = vmatpush.msra.mxu0 %v78_v0  ;;  %215 = vmatpush.msra.mxu1 %v78_v0  ;;  %v72_v6 = vld [vmem:[%s422_s1 + $0x48] sm:$0xff]  ;;  %v71_v7 = vld [vmem:[%s422_s1 + $0x40] sm:$0xff]  ;;  %v70_v8 = vld [vmem:[%s422_s1 + $0x38] sm:$0xff] }
   0x4   :  { %219 = vmatpush.msra.mxu2 %v77_v1  ;;  %220 = vmatpush.msra.mxu3 %v77_v1  ;;  %v69_v9 = vld [vmem:[%s422_s1 + $0x30] sm:$0xff]  ;;  %v68_v10 = vld [vmem:[%s422_s1 + $0x28] sm:$0xff]  ;;  %v67_v11 = vld [vmem:[%s422_s1 + $0x20] sm:$0xff] }
   0x5   :  { %80 = vmatpush.msra.mxu0 %v77_v1  ;;  %218 = vmatpush.msra.mxu1 %v77_v1  ;;  %v66_v12 = vld [vmem:[%s422_s1 + $0x18] sm:$0xff]  ;;  %v65_v13 = vld [vmem:[%s422_s1 + $0x10] sm:$0xff]  ;;  %v64_v14 = vld [vmem:[%s422_s1 + $0x8] sm:$0xff] }
   0x6   :  { %222 = vmatpush.msra.mxu2 %v76_v2  ;;  %223 = vmatpush.msra.mxu3 %v76_v2  ;;  %v63_v15 = vld [vmem:[%s422_s1] sm:$0xff]  ;;  %v56_v20 = vld [vmem:[%s423_s0 + $0x48] sm:$0xff]  ;;  %v57_v24 = vld [vmem:[%s423_s0 + $0x50] sm:$0xff] }
   0x7   :  { %81 = vmatpush.msra.mxu0 %v76_v2  ;;  %221 = vmatpush.msra.mxu1 %v76_v2  ;;  %v55_v16 = vld [vmem:[%s423_s0 + $0x40] sm:$0xff]  ;;  %v60_v21 = vld [vmem:[%s423_s0 + $0x68] sm:$0xff]  ;;  %v61_v25 = vld [vmem:[%s423_s0 + $0x70] sm:$0xff] }
   0x8   :  { %225 = vmatpush.msra.mxu2 %v75_v3  ;;  %226 = vmatpush.msra.mxu3 %v75_v3  ;;  %v59_v17 = vld [vmem:[%s423_s0 + $0x60] sm:$0xff]  ;;  %v48_v22 = vld [vmem:[%s423_s0 + $0x8] sm:$0xff]  ;;  %v49_v26 = vld [vmem:[%s423_s0 + $0x10] sm:$0xff] }
   0x9   :  { %82 = vmatpush.msra.mxu0 %v75_v3  ;;  %224 = vmatpush.msra.mxu1 %v75_v3  ;;  %v47_v18 = vld [vmem:[%s423_s0] sm:$0xff]  ;;  %v52_v23 = vld [vmem:[%s423_s0 + $0x28] sm:$0xff]  ;;  %v53_v27 = vld [vmem:[%s423_s0 + $0x30] sm:$0xff] }
   0xa   :  { %228 = vmatpush.msra.mxu2 %v74_v4  ;;  %229 = vmatpush.msra.mxu3 %v74_v4  ;;  %v51_v19 = vld [vmem:[%s423_s0 + $0x20] sm:$0xff]  ;;  %v58_v28 = vld [vmem:[%s423_s0 + $0x58] sm:$0xff] }
   0xb   :  { %83 = vmatpush.msra.mxu0 %v74_v4  ;;  %227 = vmatpush.msra.mxu1 %v74_v4  ;;  %v62_v29 = vld [vmem:[%s423_s0 + $0x78] sm:$0xff] }
   0xc   :  { %231 = vmatpush.msra.mxu2 %v73_v5  ;;  %232 = vmatpush.msra.mxu3 %v73_v5  ;;  %v50_v30 = vld [vmem:[%s423_s0 + $0x18] sm:$0xff] }
   0xd   :  { %84 = vmatpush.msra.mxu0 %v73_v5  ;;  %230 = vmatpush.msra.mxu1 %v73_v5  ;;  %v54_v31 = vld [vmem:[%s423_s0 + $0x38] sm:$0xff] }
   0xe   :  { %234 = vmatpush.msra.mxu2 %v72_v6  ;;  %235 = vmatpush.msra.mxu3 %v72_v6 }
   0xf   :  { %85 = vmatpush.msra.mxu0 %v72_v6  ;;  %233 = vmatpush.msra.mxu1 %v72_v6 }
  0x10   :  { %237 = vmatpush.msra.mxu2 %v71_v7  ;;  %238 = vmatpush.msra.mxu3 %v71_v7 }
  0x11   :  { %86 = vmatpush.msra.mxu0 %v71_v7  ;;  %236 = vmatpush.msra.mxu1 %v71_v7 }
  0x12   :  { %240 = vmatpush.msra.mxu2 %v70_v8  ;;  %241 = vmatpush.msra.mxu3 %v70_v8 }
  0x13   :  { %87 = vmatpush.msra.mxu0 %v70_v8  ;;  %239 = vmatpush.msra.mxu1 %v70_v8 }
  0x14   :  { %243 = vmatpush.msra.mxu2 %v69_v9  ;;  %244 = vmatpush.msra.mxu3 %v69_v9 }
  0x15   :  { %88 = vmatpush.msra.mxu0 %v69_v9  ;;  %242 = vmatpush.msra.mxu1 %v69_v9 }
  0x16   :  { %246 = vmatpush.msra.mxu2 %v68_v10  ;;  %247 = vmatpush.msra.mxu3 %v68_v10 }
  0x17   :  { %89 = vmatpush.msra.mxu0 %v68_v10  ;;  %245 = vmatpush.msra.mxu1 %v68_v10 }
  0x18   :  { %249 = vmatpush.msra.mxu2 %v67_v11  ;;  %250 = vmatpush.msra.mxu3 %v67_v11 }
  0x19   :  { %90 = vmatpush.msra.mxu0 %v67_v11  ;;  %248 = vmatpush.msra.mxu1 %v67_v11 }
  0x1a   :  { %252 = vmatpush.msra.mxu2 %v66_v12  ;;  %253 = vmatpush.msra.mxu3 %v66_v12 }
  0x1b   :  { %91 = vmatpush.msra.mxu0 %v66_v12  ;;  %251 = vmatpush.msra.mxu1 %v66_v12 }
  0x1c   :  { %255 = vmatpush.msra.mxu2 %v65_v13  ;;  %256 = vmatpush.msra.mxu3 %v65_v13 }
  0x1d   :  { %92 = vmatpush.msra.mxu0 %v65_v13  ;;  %254 = vmatpush.msra.mxu1 %v65_v13 }
  0x1e   :  { %258 = vmatpush.msra.mxu2 %v64_v14  ;;  %259 = vmatpush.msra.mxu3 %v64_v14 }
  0x1f   :  { %93 = vmatpush.msra.mxu0 %v64_v14  ;;  %257 = vmatpush.msra.mxu1 %v64_v14 }
  0x20   :  { %261 = vmatpush.msra.mxu2 %v63_v15  ;;  %262 = vmatpush.msra.mxu3 %v63_v15 }
  0x21   :  { %119 = vmatmul.f32.vlgmr.msra.gmra.mxu2 %v55_v16  ;;  %131 = vmatmul.f32.vlgmr.msra.gmra.mxu3 %v59_v17 }
  0x22   :  { %94 = vmatpush.msra.mxu0 %v63_v15  ;;  %260 = vmatpush.msra.mxu1 %v63_v15 }
  0x23   :  { %95 = vmatmul.f32.vlgmr.msra.gmra.mxu0 %v47_v18  ;;  %107 = vmatmul.f32.vlgmr.msra.gmra.mxu1 %v51_v19 }
  0x29   :  { %122 = vmatmul.f32.gmra.mxu2 %v56_v20  ;;  %134 = vmatmul.f32.gmra.mxu3 %v60_v21 }
  0x2b   :  { %98 = vmatmul.f32.gmra.mxu0 %v48_v22  ;;  %110 = vmatmul.f32.gmra.mxu1 %v52_v23 }
  0x31   :  { %125 = vmatmul.f32.gmra.mxu2 %v57_v24  ;;  %137 = vmatmul.f32.gmra.mxu3 %v61_v25 }
  0x33   :  { %101 = vmatmul.f32.gmra.mxu0 %v49_v26  ;;  %113 = vmatmul.f32.gmra.mxu1 %v53_v27 }
  0x39   :  { %128 = vmatmul.f32.gmra.mxu2 %v58_v28  ;;  %140 = vmatmul.f32.gmra.mxu3 %v62_v29 }
  0x3b   :  { %104 = vmatmul.f32.gmra.mxu0 %v50_v30  ;;  %116 = vmatmul.f32.gmra.mxu1 %v54_v31 }
  0xa0   :  { %v96_v32 = vpop.f32.mrf.mxu0  ;;  %v108_v33 = vpop.f32.mrf.mxu1 }
  0xa1   :  { %195 = vst [vmem:[%s424_s2] sm:$0xff] %v96_v32 }
  0xa2   :  { %199 = vst [vmem:[%s424_s2 + $0x20] sm:$0xff] %v108_v33 }
  0xa4   :  { %v120_v34 = vpop.f32.mrf.mxu2  ;;  %v132_v35 = vpop.f32.mrf.mxu3 }
  0xa5   :  { %203 = vst [vmem:[%s424_s2 + $0x40] sm:$0xff] %v120_v34 }
  0xa6   :  { %207 = vst [vmem:[%s424_s2 + $0x60] sm:$0xff] %v132_v35 }
  0xa8   :  { %v99_v36 = vpop.f32.mrf.mxu0  ;;  %v111_v37 = vpop.f32.mrf.mxu1 }
  0xa9   :  { %196 = vst [vmem:[%s424_s2 + $0x8] sm:$0xff] %v99_v36 }
  0xaa   :  { %200 = vst [vmem:[%s424_s2 + $0x28] sm:$0xff] %v111_v37 }
  0xac   :  { %v123_v38 = vpop.f32.mrf.mxu2  ;;  %v135_v39 = vpop.f32.mrf.mxu3 }
  0xad   :  { %204 = vst [vmem:[%s424_s2 + $0x48] sm:$0xff] %v123_v38 }
  0xae   :  { %208 = vst [vmem:[%s424_s2 + $0x68] sm:$0xff] %v135_v39 }
  0xb0   :  { %v102_v40 = vpop.f32.mrf.mxu0  ;;  %v114_v41 = vpop.f32.mrf.mxu1 }
  0xb1   :  { %197 = vst [vmem:[%s424_s2 + $0x10] sm:$0xff] %v102_v40 }
  0xb2   :  { %201 = vst [vmem:[%s424_s2 + $0x30] sm:$0xff] %v114_v41 }
  0xb4   :  { %v126_v42 = vpop.f32.mrf.mxu2  ;;  %v138_v43 = vpop.f32.mrf.mxu3 }
  0xb5   :  { %205 = vst [vmem:[%s424_s2 + $0x50] sm:$0xff] %v126_v42 }
  0xb6   :  { %209 = vst [vmem:[%s424_s2 + $0x70] sm:$0xff] %v138_v43 }
  0xb8   :  { %v105_v44 = vpop.f32.mrf.mxu0  ;;  %v117_v45 = vpop.f32.mrf.mxu1 }
  0xb9   :  { %198 = vst [vmem:[%s424_s2 + $0x18] sm:$0xff] %v105_v44 }
  0xba   :  { %202 = vst [vmem:[%s424_s2 + $0x38] sm:$0xff] %v117_v45 }
  0xbc   :  { %v129_v46 = vpop.f32.mrf.mxu2  ;;  %v141_v47 = vpop.f32.mrf.mxu3 }
  0xbd   :  { %206 = vst [vmem:[%s424_s2 + $0x58] sm:$0xff] %v129_v46 }
  0xbe   :  { %210 = vst [vmem:[%s424_s2 + $0x78] sm:$0xff] %v141_v47 }

// kernel: gcn_layer.3
= control target key start
LH: loop header
LB: loop body
LE: loop exit
PB: predicated region body
PF: predicated region fallthrough
CT: control target
= control target key end

     0   :  { %s454_s1 = inlined_call_operand.vmem [shape: f32[128,128], index: 1, kind: input, shape index: {}]   ;;  %s455_s2 = inlined_call_operand.vmem [shape: f32[1,128], index: 2, kind: input, shape index: {}]   ;;  %s456_s0 = inlined_call_operand.vmem [shape: f32[128,128], index: 0, kind: input, shape index: {}]   ;;  %s457_s3 = inlined_call_operand.vmem [shape: f32[128,128], index: 3, kind: output, shape index: {}]  }
   0x1   :  { %v81_v0 = vld [vmem:[%s454_s1 + $0x78] sm:$0xff]  ;;  %v80_v1 = vld [vmem:[%s454_s1 + $0x70] sm:$0xff]  ;;  %v79_v2 = vld [vmem:[%s454_s1 + $0x68] sm:$0xff] }
   0x2   :  { %239 = vmatpush.msra.mxu2 %v81_v0  ;;  %240 = vmatpush.msra.mxu3 %v81_v0  ;;  %v78_v3 = vld [vmem:[%s454_s1 + $0x60] sm:$0xff]  ;;  %v77_v4 = vld [vmem:[%s454_s1 + $0x58] sm:$0xff]  ;;  %v76_v5 = vld [vmem:[%s454_s1 + $0x50] sm:$0xff] }
   0x3   :  { %82 = vmatpush.msra.mxu0 %v81_v0  ;;  %238 = vmatpush.msra.mxu1 %v81_v0  ;;  %v75_v6 = vld [vmem:[%s454_s1 + $0x48] sm:$0xff]  ;;  %v74_v7 = vld [vmem:[%s454_s1 + $0x40] sm:$0xff]  ;;  %v73_v8 = vld [vmem:[%s454_s1 + $0x38] sm:$0xff] }
   0x4   :  { %242 = vmatpush.msra.mxu2 %v80_v1  ;;  %243 = vmatpush.msra.mxu3 %v80_v1  ;;  %v72_v9 = vld [vmem:[%s454_s1 + $0x30] sm:$0xff]  ;;  %v71_v10 = vld [vmem:[%s454_s1 + $0x28] sm:$0xff]  ;;  %v70_v11 = vld [vmem:[%s454_s1 + $0x20] sm:$0xff] }
   0x5   :  { %83 = vmatpush.msra.mxu0 %v80_v1  ;;  %241 = vmatpush.msra.mxu1 %v80_v1  ;;  %v69_v12 = vld [vmem:[%s454_s1 + $0x18] sm:$0xff]  ;;  %v68_v13 = vld [vmem:[%s454_s1 + $0x10] sm:$0xff]  ;;  %v67_v14 = vld [vmem:[%s454_s1 + $0x8] sm:$0xff] }
   0x6   :  { %245 = vmatpush.msra.mxu2 %v79_v2  ;;  %246 = vmatpush.msra.mxu3 %v79_v2  ;;  %v66_v15 = vld [vmem:[%s454_s1] sm:$0xff]  ;;  %v59_v20 = vld [vmem:[%s456_s0 + $0x48] sm:$0xff]  ;;  %v60_v24 = vld [vmem:[%s456_s0 + $0x50] sm:$0xff] }
   0x7   :  { %84 = vmatpush.msra.mxu0 %v79_v2  ;;  %244 = vmatpush.msra.mxu1 %v79_v2  ;;  %v58_v16 = vld [vmem:[%s456_s0 + $0x40] sm:$0xff]  ;;  %v63_v21 = vld [vmem:[%s456_s0 + $0x68] sm:$0xff]  ;;  %v64_v25 = vld [vmem:[%s456_s0 + $0x70] sm:$0xff] }
   0x8   :  { %248 = vmatpush.msra.mxu2 %v78_v3  ;;  %249 = vmatpush.msra.mxu3 %v78_v3  ;;  %v62_v17 = vld [vmem:[%s456_s0 + $0x60] sm:$0xff]  ;;  %v51_v22 = vld [vmem:[%s456_s0 + $0x8] sm:$0xff]  ;;  %v52_v26 = vld [vmem:[%s456_s0 + $0x10] sm:$0xff] }
   0x9   :  { %85 = vmatpush.msra.mxu0 %v78_v3  ;;  %247 = vmatpush.msra.mxu1 %v78_v3  ;;  %v50_v18 = vld [vmem:[%s456_s0] sm:$0xff]  ;;  %v55_v23 = vld [vmem:[%s456_s0 + $0x28] sm:$0xff]  ;;  %v56_v27 = vld [vmem:[%s456_s0 + $0x30] sm:$0xff] }
   0xa   :  { %251 = vmatpush.msra.mxu2 %v77_v4  ;;  %252 = vmatpush.msra.mxu3 %v77_v4  ;;  %v54_v19 = vld [vmem:[%s456_s0 + $0x20] sm:$0xff]  ;;  %v61_v28 = vld [vmem:[%s456_s0 + $0x58] sm:$0xff] }
   0xb   :  { %86 = vmatpush.msra.mxu0 %v77_v4  ;;  %250 = vmatpush.msra.mxu1 %v77_v4  ;;  %v65_v29 = vld [vmem:[%s456_s0 + $0x78] sm:$0xff]  ;;  %v286_v32 = vld [vmem:[%s455_s2] ss:$0 sm:$0xff] }
   0xc   :  { %254 = vmatpush.msra.mxu2 %v76_v5  ;;  %255 = vmatpush.msra.mxu3 %v76_v5  ;;  %v53_v30 = vld [vmem:[%s456_s0 + $0x18] sm:$0xff] }
   0xd   :  { %87 = vmatpush.msra.mxu0 %v76_v5  ;;  %253 = vmatpush.msra.mxu1 %v76_v5  ;;  %v57_v31 = vld [vmem:[%s456_s0 + $0x38] sm:$0xff] }
   0xe   :  { %257 = vmatpush.msra.mxu2 %v75_v6  ;;  %258 = vmatpush.msra.mxu3 %v75_v6 }
   0xf   :  { %88 = vmatpush.msra.mxu0 %v75_v6  ;;  %256 = vmatpush.msra.mxu1 %v75_v6 }
  0x10   :  { %260 = vmatpush.msra.mxu2 %v74_v7  ;;  %261 = vmatpush.msra.mxu3 %v74_v7 }
  0x11   :  { %89 = vmatpush.msra.mxu0 %v74_v7  ;;  %259 = vmatpush.msra.mxu1 %v74_v7 }
  0x12   :  { %263 = vmatpush.msra.mxu2 %v73_v8  ;;  %264 = vmatpush.msra.mxu3 %v73_v8 }
  0x13   :  { %90 = vmatpush.msra.mxu0 %v73_v8  ;;  %262 = vmatpush.msra.mxu1 %v73_v8 }
  0x14   :  { %266 = vmatpush.msra.mxu2 %v72_v9  ;;  %267 = vmatpush.msra.mxu3 %v72_v9 }
  0x15   :  { %91 = vmatpush.msra.mxu0 %v72_v9  ;;  %265 = vmatpush.msra.mxu1 %v72_v9 }
  0x16   :  { %269 = vmatpush.msra.mxu2 %v71_v10  ;;  %270 = vmatpush.msra.mxu3 %v71_v10 }
  0x17   :  { %92 = vmatpush.msra.mxu0 %v71_v10  ;;  %268 = vmatpush.msra.mxu1 %v71_v10 }
  0x18   :  { %272 = vmatpush.msra.mxu2 %v70_v11  ;;  %273 = vmatpush.msra.mxu3 %v70_v11 }
  0x19   :  { %93 = vmatpush.msra.mxu0 %v70_v11  ;;  %271 = vmatpush.msra.mxu1 %v70_v11 }
  0x1a   :  { %275 = vmatpush.msra.mxu2 %v69_v12  ;;  %276 = vmatpush.msra.mxu3 %v69_v12 }
  0x1b   :  { %94 = vmatpush.msra.mxu0 %v69_v12  ;;  %274 = vmatpush.msra.mxu1 %v69_v12 }
  0x1c   :  { %278 = vmatpush.msra.mxu2 %v68_v13  ;;  %279 = vmatpush.msra.mxu3 %v68_v13 }
  0x1d   :  { %95 = vmatpush.msra.mxu0 %v68_v13  ;;  %277 = vmatpush.msra.mxu1 %v68_v13 }
  0x1e   :  { %281 = vmatpush.msra.mxu2 %v67_v14  ;;  %282 = vmatpush.msra.mxu3 %v67_v14 }
  0x1f   :  { %96 = vmatpush.msra.mxu0 %v67_v14  ;;  %280 = vmatpush.msra.mxu1 %v67_v14 }
  0x20   :  { %284 = vmatpush.msra.mxu2 %v66_v15  ;;  %285 = vmatpush.msra.mxu3 %v66_v15 }
  0x21   :  { %122 = vmatmul.f32.vlgmr.msra.gmra.mxu2 %v58_v16  ;;  %134 = vmatmul.f32.vlgmr.msra.gmra.mxu3 %v62_v17 }
  0x22   :  { %97 = vmatpush.msra.mxu0 %v66_v15  ;;  %283 = vmatpush.msra.mxu1 %v66_v15 }
  0x23   :  { %98 = vmatmul.f32.vlgmr.msra.gmra.mxu0 %v50_v18  ;;  %110 = vmatmul.f32.vlgmr.msra.gmra.mxu1 %v54_v19 }
  0x29   :  { %125 = vmatmul.f32.gmra.mxu2 %v59_v20  ;;  %137 = vmatmul.f32.gmra.mxu3 %v63_v21 }
  0x2b   :  { %101 = vmatmul.f32.gmra.mxu0 %v51_v22  ;;  %113 = vmatmul.f32.gmra.mxu1 %v55_v23 }
  0x31   :  { %128 = vmatmul.f32.gmra.mxu2 %v60_v24  ;;  %140 = vmatmul.f32.gmra.mxu3 %v64_v25 }
  0x33   :  { %104 = vmatmul.f32.gmra.mxu0 %v52_v26  ;;  %116 = vmatmul.f32.gmra.mxu1 %v56_v27 }
  0x39   :  { %131 = vmatmul.f32.gmra.mxu2 %v61_v28  ;;  %143 = vmatmul.f32.gmra.mxu3 %v65_v29 }
  0x3b   :  { %107 = vmatmul.f32.gmra.mxu0 %v53_v30  ;;  %119 = vmatmul.f32.gmra.mxu1 %v57_v31 }
  0xa0   :  { %v99_v33 = vpop.f32.mrf.mxu0  ;;  %v111_v34 = vpop.f32.mrf.mxu1 }
  0xa1   :  { %v202_v35 = vadd.f32 %v286_v32, %v99_v33  ;;  %v206_v36 = vadd.f32 %v286_v32, %v111_v34 }
  0xa3   :  { %218 = vst [vmem:[%s457_s3] sm:$0xff] %v202_v35 }
  0xa4   :  { %222 = vst [vmem:[%s457_s3 + $0x20] sm:$0xff] %v206_v36  ;;  %v123_v37 = vpop.f32.mrf.mxu2  ;;  %v135_v38 = vpop.f32.mrf.mxu3 }
  0xa5   :  { %v210_v39 = vadd.f32 %v286_v32, %v123_v37  ;;  %v214_v40 = vadd.f32 %v286_v32, %v135_v38 }
  0xa7   :  { %226 = vst [vmem:[%s457_s3 + $0x40] sm:$0xff] %v210_v39 }
  0xa8   :  { %230 = vst [vmem:[%s457_s3 + $0x60] sm:$0xff] %v214_v40  ;;  %v102_v41 = vpop.f32.mrf.mxu0  ;;  %v114_v42 = vpop.f32.mrf.mxu1 }
  0xa9   :  { %v203_v43 = vadd.f32 %v286_v32, %v102_v41  ;;  %v207_v44 = vadd.f32 %v286_v32, %v114_v42 }
  0xab   :  { %219 = vst [vmem:[%s457_s3 + $0x8] sm:$0xff] %v203_v43 }
  0xac   :  { %223 = vst [vmem:[%s457_s3 + $0x28] sm:$0xff] %v207_v44  ;;  %v126_v45 = vpop.f32.mrf.mxu2  ;;  %v138_v46 = vpop.f32.mrf.mxu3 }
  0xad   :  { %v211_v47 = vadd.f32 %v286_v32, %v126_v45  ;;  %v215_v48 = vadd.f32 %v286_v32, %v138_v46 }
  0xaf   :  { %227 = vst [vmem:[%s457_s3 + $0x48] sm:$0xff] %v211_v47 }
  0xb0   :  { %231 = vst [vmem:[%s457_s3 + $0x68] sm:$0xff] %v215_v48  ;;  %v105_v49 = vpop.f32.mrf.mxu0  ;;  %v117_v50 = vpop.f32.mrf.mxu1 }
  0xb1   :  { %v204_v51 = vadd.f32 %v286_v32, %v105_v49  ;;  %v208_v52 = vadd.f32 %v286_v32, %v117_v50 }
  0xb3   :  { %220 = vst [vmem:[%s457_s3 + $0x10] sm:$0xff] %v204_v51 }
  0xb4   :  { %224 = vst [vmem:[%s457_s3 + $0x30] sm:$0xff] %v208_v52  ;;  %v129_v53 = vpop.f32.mrf.mxu2  ;;  %v141_v54 = vpop.f32.mrf.mxu3 }
  0xb5   :  { %v212_v55 = vadd.f32 %v286_v32, %v129_v53  ;;  %v216_v56 = vadd.f32 %v286_v32, %v141_v54 }
  0xb7   :  { %228 = vst [vmem:[%s457_s3 + $0x50] sm:$0xff] %v212_v55 }
  0xb8   :  { %232 = vst [vmem:[%s457_s3 + $0x70] sm:$0xff] %v216_v56  ;;  %v108_v57 = vpop.f32.mrf.mxu0  ;;  %v120_v58 = vpop.f32.mrf.mxu1 }
  0xb9   :  { %v205_v59 = vadd.f32 %v286_v32, %v108_v57  ;;  %v209_v60 = vadd.f32 %v286_v32, %v120_v58 }
  0xbb   :  { %221 = vst [vmem:[%s457_s3 + $0x18] sm:$0xff] %v205_v59 }
  0xbc   :  { %225 = vst [vmem:[%s457_s3 + $0x38] sm:$0xff] %v209_v60  ;;  %v132_v61 = vpop.f32.mrf.mxu2  ;;  %v144_v62 = vpop.f32.mrf.mxu3 }
  0xbd   :  { %v213_v63 = vadd.f32 %v286_v32, %v132_v61  ;;  %v217_v0 = vadd.f32 %v286_v32, %v144_v62 }
  0xbf   :  { %229 = vst [vmem:[%s457_s3 + $0x58] sm:$0xff] %v213_v63 }
  0xc0   :  { %233 = vst [vmem:[%s457_s3 + $0x78] sm:$0xff] %v217_v0 }

</bundles_post_ra>
